<compile_context>
chip_gen: v6e
topology: v6e:2x2x1
jax: 0.10.0
libtpu: 0.0.40
codegen_flags: <defaults>
</compile_context>

<pallas_src>
import jax
import jax.numpy as jnp
from jax.experimental import pallas as pl
from jax.experimental.pallas import tpu as pltpu


def _round_up(x, m):
    return ((x + m - 1) // m) * m


# ---------------------------------------------------------------------------
# Kernel B (grid over vocab tiles, "arbitrary"):
#   step 0:   h = tanh(ctx @ W1 + b1)  -> VMEM scratch (persists across steps)
#   each j:   logits_j = h @ W2_j + enc @ W3_j + b23_j
#             online logsumexp (m/l scratch); emit exp(logits_j - m_j) and m_j
#   last j:   emit lse = m + log(l)
# ---------------------------------------------------------------------------
def decoder_kernel(ctx_ref, w1_ref, b1_ref, enc_ref, w2_ref, w3_ref, b23_ref,
                   p_ref, m_tile_ref, lse_ref,
                   h_ref, m_ref, l_ref):
    j = pl.program_id(0)

    @pl.when(j == 0)
    def _init():
        h = jnp.tanh(
            jnp.dot(ctx_ref[...], w1_ref[...],
                    preferred_element_type=jnp.float32) + b1_ref[...])
        h_ref[...] = h.astype(h_ref.dtype)
        m_ref[...] = jnp.full(m_ref.shape, -jnp.inf, m_ref.dtype)
        l_ref[...] = jnp.zeros(l_ref.shape, l_ref.dtype)

    logits = (
        jnp.dot(h_ref[...], w2_ref[...], preferred_element_type=jnp.float32)
        + jnp.dot(enc_ref[...], w3_ref[...], preferred_element_type=jnp.float32)
        + b23_ref[...])

    m_prev = m_ref[...]
    m_new = jnp.maximum(m_prev, jnp.max(logits, axis=1, keepdims=True))
    p = jnp.exp(logits - m_new)                   # reused by both l-update and output
    p_ref[...] = p
    m_tile_ref[...] = m_new
    l_ref[...] = (l_ref[...] * jnp.exp(m_prev - m_new)
                  + jnp.sum(p, axis=1, keepdims=True))
    m_ref[...] = m_new

    @pl.when(j == pl.num_programs(0) - 1)
    def _finalize():
        lse_ref[...] = m_ref[...] + jnp.log(l_ref[...])


# ---------------------------------------------------------------------------
# Kernel C (grid over vocab tiles, parallel, aliased in-place):
#   probs_j = exp(logits_j - m_j) * exp(m_j - lse)   (one VPU mul, B exps/tile)
# ---------------------------------------------------------------------------
def normalize_kernel(p_ref, m_tile_ref, lse_ref, out_ref):
    out_ref[...] = p_ref[...] * jnp.exp(m_tile_ref[...] - lse_ref[...])


class NNLMDecoderPallas:
    def __init__(self, output_size, vocab_size, embedding_size, hidden_size,
                 C_size, key, *, tile_o=2048, vmem_limit_bytes=48 * 1024 * 1024):
        self.output_size = output_size
        self.vocab_size = vocab_size
        self.embedding_size = embedding_size
        self.hidden_size = hidden_size
        self.C_size = C_size
        self.vmem_limit_bytes = vmem_limit_bytes

        # Lane-dense vocab tile; default 2048 amortizes per-grid-step overhead and
        # keeps double-buffered bf16 weight slabs well inside a 48 MiB VMEM budget.
        tile_o = _round_up(tile_o, 128)
        self.TILE_O = min(tile_o, _round_up(output_size, 128))
        self.O_pad = pl.cdiv(output_size, self.TILE_O) * self.TILE_O
        self.n_tiles = self.O_pad // self.TILE_O

        ks = jax.random.split(key, 7)
        s = 0.1
        H = hidden_size
        self.embedding = s * jax.random.normal(
            ks[0], (vocab_size, embedding_size), jnp.float32)
        # nn.Linear weight is [out, in]; store the transpose [in, out], bf16 for MXU.
        self.w1 = (s * jax.random.normal(
            ks[1], (C_size * embedding_size, H), jnp.float32)).astype(jnp.bfloat16)
        self.b1 = s * jax.random.normal(ks[2], (1, H), jnp.float32)

        w2 = s * jax.random.normal(ks[3], (H, output_size), jnp.float32)
        b2 = s * jax.random.normal(ks[4], (1, output_size), jnp.float32)
        w3 = s * jax.random.normal(ks[5], (H, output_size), jnp.float32)
        b3 = s * jax.random.normal(ks[6], (1, output_size), jnp.float32)

        # Pad vocab axis; padded weight cols are 0 and padded bias cols are -1e30 so
        # padded logits contribute exactly zero probability mass (pad < TILE_O, so a
        # tile is never all-padding and the running max stays finite).
        pad = self.O_pad - output_size
        w2p = jnp.pad(w2, ((0, 0), (0, pad)))
        w3p = jnp.pad(w3, ((0, 0), (0, pad)))
        b23 = jnp.concatenate(
            [b2 + b3, jnp.full((1, pad), -1e30, jnp.float32)], axis=1)

        # Tile-major layout: one contiguous DMA slab per grid step per operand.
        self.w2_t = (w2p.reshape(H, self.n_tiles, self.TILE_O)
                     .transpose(1, 0, 2).astype(jnp.bfloat16))       # [T, H, TILE_O]
        self.w3_t = (w3p.reshape(H, self.n_tiles, self.TILE_O)
                     .transpose(1, 0, 2).astype(jnp.bfloat16))       # [T, H, TILE_O]
        self.b23_t = b23.reshape(self.n_tiles, 1, self.TILE_O)       # [T, 1, TILE_O]

    def __call__(self, encoder_output, predict_sequence):
        """encoder_output: [B, hidden_size] f32, predict_sequence: [B, L] int32."""
        B = encoder_output.shape[0]
        B_pad = max(16, _round_up(B, 16))       # bf16 sublane quantum
        H = self.hidden_size
        CE = self.C_size * self.embedding_size
        TILE_O, O_pad, n_tiles = self.TILE_O, self.O_pad, self.n_tiles

        # --- glue: take last C tokens, embed, pad short context, flatten ---
        c_seq = predict_sequence[:, -self.C_size:]
        contexts = jnp.take(self.embedding, c_seq, axis=0)           # [B, act, E]
        actual = contexts.shape[1]
        if actual < self.C_size:
            contexts = jnp.concatenate(
                [contexts,
                 jnp.zeros((B, self.C_size - actual, self.embedding_size),
                           jnp.float32)], axis=1)
        contexts = contexts.reshape(B, -1)                           # [B, C*E]

        if B_pad != B:
            contexts = jnp.pad(contexts, ((0, B_pad - B), (0, 0)))
            enc = jnp.pad(encoder_output, ((0, B_pad - B), (0, 0)))
        else:
            enc = encoder_output
        ctx_bf = contexts.astype(jnp.bfloat16)
        enc_bf = enc.astype(jnp.bfloat16)

        cost = pl.CostEstimate(
            flops=2 * B_pad * CE * H + 4 * B_pad * H * O_pad,
            transcendentals=B_pad * (O_pad + H),
            bytes_accessed=(2 * H * O_pad * 2 + O_pad * 4            # streamed weights
                            + B_pad * O_pad * 4                       # exp store
                            + B_pad * (CE + 2 * H) * 2 + CE * H * 2), # resident
        )

        # --- Kernel B: hidden state (step 0) + streamed fused matmul + online lse ---
        p_store, m_tiles, lse = pl.pallas_call(
            decoder_kernel,
            out_shape=(jax.ShapeDtypeStruct((B_pad, O_pad), jnp.float32),
                       jax.ShapeDtypeStruct((n_tiles, B_pad, 1), jnp.float32),
                       jax.ShapeDtypeStruct((B_pad, 1), jnp.float32)),
            grid_spec=pltpu.PrefetchScalarGridSpec(
                num_scalar_prefetch=0,
                grid=(n_tiles,),
                in_specs=[
                    pl.BlockSpec((B_pad, CE), lambda j: (0, 0)),            # ctx (resident)
                    pl.BlockSpec((CE, H), lambda j: (0, 0)),                # W1  (resident)
                    pl.BlockSpec((1, H), lambda j: (0, 0)),                 # b1  (resident)
                    pl.BlockSpec((B_pad, H), lambda j: (0, 0)),             # enc (resident)
                    pl.BlockSpec((None, H, TILE_O), lambda j: (j, 0, 0)),   # W2 tile (streamed)
                    pl.BlockSpec((None, H, TILE_O), lambda j: (j, 0, 0)),   # W3 tile (streamed)
                    pl.BlockSpec((None, 1, TILE_O), lambda j: (j, 0, 0)),   # b23 tile (streamed)
                ],
                out_specs=[
                    pl.BlockSpec((B_pad, TILE_O), lambda j: (0, j)),        # exp(logits - m_j)
                    pl.BlockSpec((None, B_pad, 1), lambda j: (j, 0, 0)),    # m_j per tile
                    pl.BlockSpec((B_pad, 1), lambda j: (0, 0)),             # lse (resident)
                ],
                scratch_shapes=[pltpu.VMEM((B_pad, H), jnp.bfloat16),       # h
                                pltpu.VMEM((B_pad, 1), jnp.float32),        # m running
                                pltpu.VMEM((B_pad, 1), jnp.float32)]),      # l running
            compiler_params=pltpu.CompilerParams(
                dimension_semantics=("arbitrary",),
                vmem_limit_bytes=self.vmem_limit_bytes),
            cost_estimate=cost,
        )(ctx_bf, self.w1, self.b1, enc_bf, self.w2_t, self.w3_t, self.b23_t)

        # --- Kernel C: probs = stored_exp * exp(m_j - lse), in-place (aliased) ---
        probs_pad = pl.pallas_call(
            normalize_kernel,
            out_shape=jax.ShapeDtypeStruct((B_pad, O_pad), jnp.float32),
            grid_spec=pltpu.PrefetchScalarGridSpec(
                num_scalar_prefetch=0,
                grid=(n_tiles,),
                in_specs=[
                    pl.BlockSpec((B_pad, TILE_O), lambda j: (0, j)),
                    pl.BlockSpec((None, B_pad, 1), lambda j: (j, 0, 0)),
                    pl.BlockSpec((B_pad, 1), lambda j: (0, 0)),
                ],
                out_specs=pl.BlockSpec((B_pad, TILE_O), lambda j: (0, j))),
            compiler_params=pltpu.CompilerParams(
                dimension_semantics=("parallel",)),
            input_output_aliases={0: 0},
        )(p_store, m_tiles, lse)

        # strip batch / vocab padding
        return probs_pad[:B, :self.output_size]


def _reference_forward(dec, encoder_output, predict_sequence):
    """Pure-JAX reference mirroring the kernel's bf16-weight forward semantics."""
    B = encoder_output.shape[0]
    H = dec.hidden_size
    c_seq = predict_sequence[:, -dec.C_size:]
    ctx = jnp.take(dec.embedding, c_seq, axis=0)
    if ctx.shape[1] < dec.C_size:
        ctx = jnp.concatenate(
            [ctx, jnp.zeros((B, dec.C_size - ctx.shape[1], dec.embedding_size),
                            jnp.float32)], axis=1)
    ctx = ctx.reshape(B, -1).astype(jnp.bfloat16).astype(jnp.float32)
    w1 = dec.w1.astype(jnp.float32)
    h = jnp.tanh(jnp.dot(ctx, w1, precision=jax.lax.Precision.HIGHEST) + dec.b1)
    h = h.astype(jnp.bfloat16).astype(jnp.float32)
    enc = encoder_output.astype(jnp.bfloat16).astype(jnp.float32)
    w2 = (dec.w2_t.transpose(1, 0, 2).reshape(H, dec.O_pad)[:, :dec.output_size]
          .astype(jnp.float32))
    w3 = (dec.w3_t.transpose(1, 0, 2).reshape(H, dec.O_pad)[:, :dec.output_size]
          .astype(jnp.float32))
    b23 = dec.b23_t.transpose(1, 0, 2).reshape(1, dec.O_pad)[:, :dec.output_size]
    logits = (jnp.dot(h, w2, precision=jax.lax.Precision.HIGHEST)
              + jnp.dot(enc, w3, precision=jax.lax.Precision.HIGHEST) + b23)
    return jax.nn.softmax(logits, axis=1)


if __name__ == "__main__":
    # Small deterministic shapes consistent with the module's forward pass.
    batch_size = 2
    vocab_size = 32
    embedding_size = 16
    hidden_size = 32
    output_size = 32      # one probability per vocabulary word
    C_size = 4
    seq_len = 8           # previously-predicted sequence length (>= C_size)

    root = jax.random.PRNGKey(0)
    k_params, k_enc, k_seq = jax.random.split(root, 3)

    decoder = NNLMDecoderPallas(output_size, vocab_size, embedding_size,
                                hidden_size, C_size, k_params)

    encoder_output = jax.random.normal(
        k_enc, (batch_size, hidden_size), jnp.float32)
    predict_sequence = jax.random.randint(
        k_seq, (batch_size, seq_len), 0, vocab_size, dtype=jnp.int32)

    probs = decoder(encoder_output, predict_sequence)
    probs = jax.block_until_ready(probs)

    # Sanity check against the pure-JAX reference (bf16-weight semantics).
    ref = _reference_forward(decoder, encoder_output, predict_sequence)
    assert probs.shape == (batch_size, output_size)
    assert jnp.allclose(probs, ref, atol=1e-3, rtol=1e-3)
    assert jnp.allclose(jnp.sum(probs, axis=1), 1.0, atol=1e-4)

    print("KERNEL_OK")
</pallas_src>

<mosaic_0001>
module attributes {stable_mosaic.version = 11 : i64} {
  func.func @decoder_kernel(%arg0: i32, %arg1: memref<16x64xbf16, #tpu.memory_space<vmem>>, %arg2: memref<64x32xbf16, #tpu.memory_space<vmem>>, %arg3: memref<1x32xf32, #tpu.memory_space<vmem>>, %arg4: memref<16x32xbf16, #tpu.memory_space<vmem>>, %arg5: memref<1x32x128xbf16, #tpu.memory_space<vmem>>, %arg6: memref<1x32x128xbf16, #tpu.memory_space<vmem>>, %arg7: memref<1x1x128xf32, #tpu.memory_space<vmem>>, %arg8: memref<16x128xf32, #tpu.memory_space<vmem>>, %arg9: memref<1x16x1xf32, #tpu.memory_space<vmem>>, %arg10: memref<16x1xf32, #tpu.memory_space<vmem>>, %arg11: memref<16x32xbf16, #tpu.memory_space<vmem>>, %arg12: memref<16x1xf32, #tpu.memory_space<vmem>>, %arg13: memref<16x1xf32, #tpu.memory_space<vmem>>) attributes {dimension_semantics = [#tpu.dimension_semantics<arbitrary>], iteration_bounds = array<i64: 1>, scalar_prefetch = 0 : i64, scratch_operands = 3 : i64, tpu.core_type = #tpu.core_type<tc>, window_params = [{pipeline_mode = #tpu.pipeline_mode<synchronous>, transform_indices = @transform_0, window_bounds = array<i64: 16, 64>}, {pipeline_mode = #tpu.pipeline_mode<synchronous>, transform_indices = @transform_1, window_bounds = array<i64: 64, 32>}, {pipeline_mode = #tpu.pipeline_mode<synchronous>, transform_indices = @transform_2, window_bounds = array<i64: 1, 32>}, {pipeline_mode = #tpu.pipeline_mode<synchronous>, transform_indices = @transform_3, window_bounds = array<i64: 16, 32>}, {transform_indices = @transform_4, window_bounds = array<i64: 1, 32, 128>}, {transform_indices = @transform_5, window_bounds = array<i64: 1, 32, 128>}, {transform_indices = @transform_6, window_bounds = array<i64: 1, 1, 128>}, {transform_indices = @transform_7, window_bounds = array<i64: 16, 128>}, {transform_indices = @transform_8, window_bounds = array<i64: 1, 16, 1>}, {pipeline_mode = #tpu.pipeline_mode<synchronous>, transform_indices = @transform_9, window_bounds = array<i64: 16, 1>}]} {
    %c0_i32 = arith.constant 0 : i32
    %0 = arith.cmpi eq, %arg0, %c0_i32 : i32
    %1 = arith.extui %0 : i1 to i32
    %c0_i32_0 = arith.constant 0 : i32
    %2 = arith.cmpi ne, %1, %c0_i32_0 : i32
    scf.if %2 {
      %c0_31 = arith.constant 0 : index
      %c0_32 = arith.constant 0 : index
      %39 = vector.load %arg1[%c0_31, %c0_32] : memref<16x64xbf16, #tpu.memory_space<vmem>>, vector<16x64xbf16>
      %c0_33 = arith.constant 0 : index
      %c0_34 = arith.constant 0 : index
      %40 = vector.load %arg2[%c0_33, %c0_34] : memref<64x32xbf16, #tpu.memory_space<vmem>>, vector<64x32xbf16>
      %cst_35 = arith.constant dense<0.000000e+00> : vector<16x32xf32>
      %41 = tpu.matmul %39, %40, %cst_35 {dimension_numbers = #tpu.dot_dimension_numbers<[1], [0], [0], [1], [0, 0, 1, 1], [], []>} : vector<16x64xbf16>, vector<64x32xbf16>, vector<16x32xf32> -> vector<16x32xf32>
      %c0_36 = arith.constant 0 : index
      %c0_37 = arith.constant 0 : index
      %42 = vector.load %arg3[%c0_36, %c0_37] : memref<1x32xf32, #tpu.memory_space<vmem>>, vector<1x32xf32>
      %43 = vector.broadcast %42 : vector<1x32xf32> to vector<16x32xf32>
      %44 = arith.addf %41, %43 : vector<16x32xf32>
      %45 = math.tanh %44 : vector<16x32xf32>
      %46 = arith.truncf %45 : vector<16x32xf32> to vector<16x32xbf16>
      %c0_38 = arith.constant 0 : index
      %c0_39 = arith.constant 0 : index
      %47 = vector.load %arg11[%c0_38, %c0_39] : memref<16x32xbf16, #tpu.memory_space<vmem>>, vector<16x32xbf16>
      tpu.vector_store %arg11[%c0_38, %c0_39], %46 {strides = array<i32>} : memref<16x32xbf16, #tpu.memory_space<vmem>>, vector<16x32xbf16>,
      %cst_40 = arith.constant 0xFF800000 : f32
      %48 = vector.broadcast %cst_40 : f32 to vector<16x1xf32>
      %c0_41 = arith.constant 0 : index
      %c0_42 = arith.constant 0 : index
      %49 = vector.load %arg12[%c0_41, %c0_42] : memref<16x1xf32, #tpu.memory_space<vmem>>, vector<16x1xf32>
      tpu.vector_store %arg12[%c0_41, %c0_42], %48 {strides = array<i32>} : memref<16x1xf32, #tpu.memory_space<vmem>>, vector<16x1xf32>,
      %cst_43 = arith.constant 0.000000e+00 : f32
      %50 = vector.broadcast %cst_43 : f32 to vector<16x1xf32>
      %c0_44 = arith.constant 0 : index
      %c0_45 = arith.constant 0 : index
      %51 = vector.load %arg13[%c0_44, %c0_45] : memref<16x1xf32, #tpu.memory_space<vmem>>, vector<16x1xf32>
      tpu.vector_store %arg13[%c0_44, %c0_45], %50 {strides = array<i32>} : memref<16x1xf32, #tpu.memory_space<vmem>>, vector<16x1xf32>,
    } else {
    }
    %c0 = arith.constant 0 : index
    %c0_1 = arith.constant 0 : index
    %3 = vector.load %arg11[%c0, %c0_1] : memref<16x32xbf16, #tpu.memory_space<vmem>>, vector<16x32xbf16>
    %c0_2 = arith.constant 0 : index
    %c0_3 = arith.constant 0 : index
    %c0_4 = arith.constant 0 : index
    %4 = vector.load %arg5[%c0_2, %c0_3, %c0_4] : memref<1x32x128xbf16, #tpu.memory_space<vmem>>, vector<1x32x128xbf16>
    %5 = vector.shape_cast %4 : vector<1x32x128xbf16> to vector<32x128xbf16>
    %cst = arith.constant dense<0.000000e+00> : vector<16x128xf32>
    %6 = tpu.matmul %3, %5, %cst {dimension_numbers = #tpu.dot_dimension_numbers<[1], [0], [0], [1], [0, 0, 1, 1], [], []>} : vector<16x32xbf16>, vector<32x128xbf16>, vector<16x128xf32> -> vector<16x128xf32>
    %c0_5 = arith.constant 0 : index
    %c0_6 = arith.constant 0 : index
    %7 = vector.load %arg4[%c0_5, %c0_6] : memref<16x32xbf16, #tpu.memory_space<vmem>>, vector<16x32xbf16>
    %c0_7 = arith.constant 0 : index
    %c0_8 = arith.constant 0 : index
    %c0_9 = arith.constant 0 : index
    %8 = vector.load %arg6[%c0_7, %c0_8, %c0_9] : memref<1x32x128xbf16, #tpu.memory_space<vmem>>, vector<1x32x128xbf16>
    %9 = vector.shape_cast %8 : vector<1x32x128xbf16> to vector<32x128xbf16>
    %cst_10 = arith.constant dense<0.000000e+00> : vector<16x128xf32>
    %10 = tpu.matmul %7, %9, %cst_10 {dimension_numbers = #tpu.dot_dimension_numbers<[1], [0], [0], [1], [0, 0, 1, 1], [], []>} : vector<16x32xbf16>, vector<32x128xbf16>, vector<16x128xf32> -> vector<16x128xf32>
    %11 = arith.addf %6, %10 : vector<16x128xf32>
    %c0_11 = arith.constant 0 : index
    %c0_12 = arith.constant 0 : index
    %c0_13 = arith.constant 0 : index
    %12 = vector.load %arg7[%c0_11, %c0_12, %c0_13] : memref<1x1x128xf32, #tpu.memory_space<vmem>>, vector<1x1x128xf32>
    %13 = vector.shape_cast %12 : vector<1x1x128xf32> to vector<1x128xf32>
    %14 = vector.broadcast %13 : vector<1x128xf32> to vector<16x128xf32>
    %15 = arith.addf %11, %14 : vector<16x128xf32>
    %c0_14 = arith.constant 0 : index
    %c0_15 = arith.constant 0 : index
    %16 = vector.load %arg12[%c0_14, %c0_15] : memref<16x1xf32, #tpu.memory_space<vmem>>, vector<16x1xf32>
    %cst_16 = arith.constant dense<0xFF800000> : vector<16xf32>
    %17 = vector.multi_reduction <maximumf>, %15, %cst_16 [1] : vector<16x128xf32> to vector<16xf32>
    %18 = vector.shape_cast %17 : vector<16xf32> to vector<16x1xf32>
    %19 = arith.maximumf %16, %18 : vector<16x1xf32>
    %20 = vector.broadcast %19 : vector<16x1xf32> to vector<16x128xf32>
    %21 = arith.subf %15, %20 : vector<16x128xf32>
    %22 = math.exp %21 : vector<16x128xf32>
    %c0_17 = arith.constant 0 : index
    %c0_18 = arith.constant 0 : index
    %23 = vector.load %arg8[%c0_17, %c0_18] : memref<16x128xf32, #tpu.memory_space<vmem>>, vector<16x128xf32>
    tpu.vector_store %arg8[%c0_17, %c0_18], %22 {strides = array<i32>} : memref<16x128xf32, #tpu.memory_space<vmem>>, vector<16x128xf32>,
    %c0_19 = arith.constant 0 : index
    %c0_20 = arith.constant 0 : index
    %c0_21 = arith.constant 0 : index
    %24 = vector.load %arg9[%c0_19, %c0_20, %c0_21] : memref<1x16x1xf32, #tpu.memory_space<vmem>>, vector<1x16x1xf32>
    %25 = vector.shape_cast %24 : vector<1x16x1xf32> to vector<16x1xf32>
    %26 = vector.shape_cast %19 : vector<16x1xf32> to vector<1x16x1xf32>
    tpu.vector_store %arg9[%c0_19, %c0_20, %c0_21], %26 {strides = array<i32>} : memref<1x16x1xf32, #tpu.memory_space<vmem>>, vector<1x16x1xf32>,
    %c0_22 = arith.constant 0 : index
    %c0_23 = arith.constant 0 : index
    %27 = vector.load %arg13[%c0_22, %c0_23] : memref<16x1xf32, #tpu.memory_space<vmem>>, vector<16x1xf32>
    %28 = arith.subf %16, %19 : vector<16x1xf32>
    %29 = math.exp %28 : vector<16x1xf32>
    %30 = arith.mulf %27, %29 : vector<16x1xf32>
    %cst_24 = arith.constant dense<0.000000e+00> : vector<16xf32>
    %31 = vector.multi_reduction <add>, %22, %cst_24 [1] : vector<16x128xf32> to vector<16xf32>
    %32 = vector.shape_cast %31 : vector<16xf32> to vector<16x1xf32>
    %33 = arith.addf %30, %32 : vector<16x1xf32>
    %c0_25 = arith.constant 0 : index
    %c0_26 = arith.constant 0 : index
    %34 = vector.load %arg13[%c0_25, %c0_26] : memref<16x1xf32, #tpu.memory_space<vmem>>, vector<16x1xf32>
    tpu.vector_store %arg13[%c0_25, %c0_26], %33 {strides = array<i32>} : memref<16x1xf32, #tpu.memory_space<vmem>>, vector<16x1xf32>,
    %c0_27 = arith.constant 0 : index
    %c0_28 = arith.constant 0 : index
    %35 = vector.load %arg12[%c0_27, %c0_28] : memref<16x1xf32, #tpu.memory_space<vmem>>, vector<16x1xf32>
    tpu.vector_store %arg12[%c0_27, %c0_28], %19 {strides = array<i32>} : memref<16x1xf32, #tpu.memory_space<vmem>>, vector<16x1xf32>,
    %c0_i32_29 = arith.constant 0 : i32
    %36 = arith.cmpi eq, %arg0, %c0_i32_29 : i32
    %37 = arith.extui %36 : i1 to i32
    %c0_i32_30 = arith.constant 0 : i32
    %38 = arith.cmpi ne, %37, %c0_i32_30 : i32
    scf.if %38 {
      %c0_31 = arith.constant 0 : index
      %c0_32 = arith.constant 0 : index
      %39 = vector.load %arg12[%c0_31, %c0_32] : memref<16x1xf32, #tpu.memory_space<vmem>>, vector<16x1xf32>
      %c0_33 = arith.constant 0 : index
      %c0_34 = arith.constant 0 : index
      %40 = vector.load %arg13[%c0_33, %c0_34] : memref<16x1xf32, #tpu.memory_space<vmem>>, vector<16x1xf32>
      %41 = math.log %40 : vector<16x1xf32>
      %42 = arith.addf %39, %41 : vector<16x1xf32>
      %c0_35 = arith.constant 0 : index
      %c0_36 = arith.constant 0 : index
      %43 = vector.load %arg10[%c0_35, %c0_36] : memref<16x1xf32, #tpu.memory_space<vmem>>, vector<16x1xf32>
      tpu.vector_store %arg10[%c0_35, %c0_36], %42 {strides = array<i32>} : memref<16x1xf32, #tpu.memory_space<vmem>>, vector<16x1xf32>,
    } else {
    }
    return
  }
  func.func @transform_0(%arg0: i32) -> (i32, i32) {
    %c0_i32 = arith.constant 0 : i32
    %c0_i32_0 = arith.constant 0 : i32
    %c0_i32_1 = arith.constant 0 : i32
    return %c0_i32, %c0_i32_0 : i32, i32
  }
  func.func @transform_1(%arg0: i32) -> (i32, i32) {
    %c0_i32 = arith.constant 0 : i32
    %c0_i32_0 = arith.constant 0 : i32
    %c0_i32_1 = arith.constant 0 : i32
    return %c0_i32, %c0_i32_0 : i32, i32
  }
  func.func @transform_2(%arg0: i32) -> (i32, i32) {
    %c0_i32 = arith.constant 0 : i32
    %c0_i32_0 = arith.constant 0 : i32
    %c0_i32_1 = arith.constant 0 : i32
    return %c0_i32, %c0_i32_0 : i32, i32
  }
  func.func @transform_3(%arg0: i32) -> (i32, i32) {
    %c0_i32 = arith.constant 0 : i32
    %c0_i32_0 = arith.constant 0 : i32
    %c0_i32_1 = arith.constant 0 : i32
    return %c0_i32, %c0_i32_0 : i32, i32
  }
  func.func @transform_4(%arg0: i32) -> (i32, i32, i32) {
    %c0_i32 = arith.constant 0 : i32
    %c0_i32_0 = arith.constant 0 : i32
    %c0_i32_1 = arith.constant 0 : i32
    return %arg0, %c0_i32, %c0_i32_0 : i32, i32, i32
  }
  func.func @transform_5(%arg0: i32) -> (i32, i32, i32) {
    %c0_i32 = arith.constant 0 : i32
    %c0_i32_0 = arith.constant 0 : i32
    %c0_i32_1 = arith.constant 0 : i32
    return %arg0, %c0_i32, %c0_i32_0 : i32, i32, i32
  }
  func.func @transform_6(%arg0: i32) -> (i32, i32, i32) {
    %c0_i32 = arith.constant 0 : i32
    %c0_i32_0 = arith.constant 0 : i32
    %c0_i32_1 = arith.constant 0 : i32
    return %arg0, %c0_i32, %c0_i32_0 : i32, i32, i32
  }
  func.func @transform_7(%arg0: i32) -> (i32, i32) {
    %c0_i32 = arith.constant 0 : i32
    %c0_i32_0 = arith.constant 0 : i32
    return %c0_i32, %arg0 : i32, i32
  }
  func.func @transform_8(%arg0: i32) -> (i32, i32, i32) {
    %c0_i32 = arith.constant 0 : i32
    %c0_i32_0 = arith.constant 0 : i32
    %c0_i32_1 = arith.constant 0 : i32
    return %arg0, %c0_i32, %c0_i32_0 : i32, i32, i32
  }
  func.func @transform_9(%arg0: i32) -> (i32, i32) {
    %c0_i32 = arith.constant 0 : i32
    %c0_i32_0 = arith.constant 0 : i32
    %c0_i32_1 = arith.constant 0 : i32
    return %c0_i32, %c0_i32_0 : i32, i32
  }
}

</mosaic_0001>

<bundles_post_ra>
// kernel: tpu_custom_call.1
= control target key start
LH: loop header
LB: loop body
LE: loop exit
PB: predicated region body
PF: predicated region fallthrough
CT: control target
= control target key end

     0   :  { %v493_v1 = vmov 0.0   ;;  %vm494_vm0 = vmmov 0   ;;  %s618_s0 = inlined_call_operand.vmem [shape: bf16[16,64], index: 0, kind: input, shape index: {}]   ;;  %s619_s1 = inlined_call_operand.vmem [shape: bf16[64,32], index: 1, kind: input, shape index: {}]   ;;  %s620_s2 = inlined_call_operand.vmem [shape: f32[1,32], index: 2, kind: input, shape index: {}]   ;;  %s621_s3 = inlined_call_operand.vmem [shape: bf16[16,32], index: 3, kind: input, shape index: {}]   ;;  %s622_s4 = inlined_call_operand.vmem [shape: bf16[1,32,128], index: 4, kind: input, shape index: {}]   ;;  %s623_s5 = inlined_call_operand.vmem [shape: bf16[1,32,128], index: 5, kind: input, shape index: {}]   ;;  %s624_s6 = inlined_call_operand.vmem [shape: f32[1,1,128], index: 6, kind: input, shape index: {}]   ;;  %s625_s7 = inlined_call_operand.hbm [shape: f32[16,128], index: 7, kind: output, shape index: {0}]   ;;  %s626_s8 = inlined_call_operand.vmem [shape: f32[1,16,1], index: 8, kind: output, shape index: {1}]   ;;  %s627_s9 = inlined_call_operand.vmem [shape: f32[16,1], index: 9, kind: output, shape index: {2}]  }
   0x1   :  { %v444_v0 = vld [vmem:[%s619_s1 + $0x18] sm:$0xff]   ;;  %407 = vmatprep.subr.bf16.mxu0 %v493_v1  ;;  %419 = vmatprep.subr.bf16.mxu1 %v493_v1  ;;  %v445_v2 = vld [vmem:[%s619_s1 + $0x10] sm:$0xff]   ;;  %v446_v3 = vld [vmem:[%s619_s1 + $0x8] sm:$0xff]  }
   0x2   :  { %408 = vmatpush3.bf16.msra.mxu0 %v444_v0  ;;  %415 = vmatprep.mubr.msk.bf16.mxu0 %vm494_vm0, %v493_v1 }
   0x3   :  { %409 = vmatprep.subr.bf16.mxu0 %v493_v1  ;;  %423 = vmatprep.mubr.msk.bf16.mxu1 %vm494_vm0, %v493_v1 }
   0x6   :  { %410 = vmatpush3.bf16.msra.mxu0 %v445_v2 }
   0x7   :  { %411 = vmatprep.subr.bf16.mxu0 %v493_v1 }
   0x8   :  { %15 = vsyncpa [#allocation6], 0  ;;  %v447_v4 = vld [vmem:[%s619_s1] sm:$0xff]   ;;  %vm81_vm1 = vcmask 523264   ;;  %v449_v6 = vld [vmem:[%s623_s5 + $0x8] sm:$0xff]   ;;  %vm173_vm2 = vcmask 261120  }
   0x9   :  { %v448_v5 = vld [vmem:[%s618_s0] sm:$0xff]   ;;  %420 = vmatpush3.bf16.msra.mxu1 %v449_v6  ;;  %v452_v9 = vld [vmem:[%s622_s4 + $0x8] sm:$0xff]   ;;  %vm136_vm3 = vcmask 257024   ;;  %vm139_vm4 = vcmask 7168   ;;  %v495_v27 = vmov -inf   ;;  %v496_v37 = vmov 0  }
   0xa   :  { %412 = vmatpush3.bf16.msra.mxu0 %v446_v3  ;;  %421 = vmatprep.subr.bf16.mxu1 %v493_v1  ;;  %v450_v7 = vld [vmem:[%s623_s5] sm:$0xff]   ;;  %140 = vst.msk [vmem:[#allocation3] sm:$0xff] %vm139_vm4, %v495_v27  ;;  %141 = vst.msk [vmem:[#allocation3 + $0x8] sm:$0xff] %vm139_vm4, %v495_v27  ;;  %s497_s30 = smov [#allocation5]  }
   0xb   :  { %413 = vmatprep.subr.bf16.mxu0 %v493_v1  ;;  %v451_v8 = vld [vmem:[%s621_s3] sm:$0xff]   ;;  %142 = vst.msk [vmem:[#allocation4] sm:$0xff] %vm139_vm4, %v493_v1  ;;  %143 = vst.msk [vmem:[#allocation4 + $0x8] sm:$0xff] %vm139_vm4, %v493_v1  ;;  %442 = vset.pattern.permute.xlu1 %v496_v37 }
   0xc   :  { %v453_v10 = vld [vmem:[%s622_s4] sm:$0xff]   ;;  %443 = vset.pattern.permute.xlu0 %v496_v37 }
   0xd   :  { %422 = vmatpush3.bf16.msra.mxu1 %v450_v7  ;;  %v376_v11 = vld [vmem:[%s620_s2] ss:$0 sm:$0xff] }
   0xe   :  { %414 = vmatpush3.bf16.msra.mxu0 %v447_v4  ;;  %427 = vmatprep.subr.bf16.mxu1 %v493_v1  ;;  %v393_v29 = vld [vmem:[%s624_s6] ss:$0 sm:$0xff] }
  0x10   :  { %424 = vmatmul.mubr.msk.bf16.vlgmr.msra.gmra.mxu1 %vm173_vm2, %v451_v8 }
  0x11   :  { %416 = vmatmul.mubr.msk.bf16.vlgmr.msra.gmra.mxu0 %vm81_vm1, %v448_v5  ;;  %431 = vmatprep.mubr.msk.bf16.mxu1 %vm494_vm0, %v493_v1  ;;  %v288_v38 = vld [vmem:[#allocation3] sm:$0xff]  ;;  %v289_v41 = vld [vmem:[#allocation3 + $0x8] sm:$0xff] }
  0x12   :  { %428 = vmatpush3.bf16.msra.mxu1 %v452_v9 }
  0x13   :  { %429 = vmatprep.subr.bf16.mxu1 %v493_v1 }
  0x16   :  { %430 = vmatpush3.bf16.msra.mxu1 %v453_v10 }
  0xd0   :  { %v211_v23 = vpop.f32.mrf.mxu1 }
  0xd1   :  { %v119_v12 = vpop.f32.mrf.mxu0 }
  0xd2   :  { %v120_v13 = vadd.f32 %v376_v11, %v119_v12  ;;  %v425_v24 = vpop.f32.mrf.mxu1 }
  0xd3   :  { %v417_v14 = vpop.f32.mrf.mxu0 }
  0xd4   :  { %455 = vtanh.f32 %v120_v13  ;;  %v214_v25 = vpop.f32.mrf.mxu1 }
  0xd5   :  { %v122_v15 = vpop.f32.mrf.mxu0 }
  0xd6   :  { %v123_v16 = vadd.f32 %v376_v11, %v122_v15  ;;  %v426_v26 = vpop.f32.mrf.mxu1 }
  0xd7   :  { %v418_v17 = vpop.f32.mrf.mxu0 }
  0xd8   :  { %457 = vtanh.f32 %v123_v16 }
  0xe1   :  { %v456_v18 = vpop.eup %455 }
  0xe2   :  { %v394_v19 = vpack.c.bf16 %v456_v18, %v456_v18 }
  0xe4   :  { %137 = vst.msk [vmem:[#allocation2] sm:$0xf] %vm136_vm3, %v394_v19 }
  0xe5   :  { %v458_v20 = vpop.eup %457 }
  0xe6   :  { %v395_v21 = vpack.c.bf16 %v458_v20, %v458_v20 }
  0xe8   :  { %138 = vst.msk [vmem:[#allocation2 + $0x4] sm:$0xf] %vm136_vm3, %v395_v21 }
  0xef   :  { %v454_v22 = vld [vmem:[#allocation2] sm:$0xff]  }
  0xf0   :  { %432 = vmatmul.mubr.msk.bf16.vlgmr.msra.gmra.mxu1 %vm173_vm2, %v454_v22 }
 0x1b0   :  { %v272_v28 = vpop.f32.mrf.mxu1 }
 0x1b1   :  { %v273_v30 = vadd.f32 %v272_v28, %v211_v23 }
 0x1b2   :  { %v433_v31 = vpop.f32.mrf.mxu1 }
 0x1b3   :  { %v286_v32 = vadd.f32 %v393_v29, %v273_v30 }
 0x1b4   :  { %v275_v33 = vpop.f32.mrf.mxu1 }
 0x1b5   :  { %v276_v34 = vadd.f32 %v275_v33, %v214_v25  ;;  %290 = vmax.xlane.f32.xlu0 %v286_v32 }
 0x1b6   :  { %v434_v35 = vpop.f32.mrf.mxu1 }
 0x1b7   :  { %v287_v36 = vadd.f32 %v393_v29, %v276_v34 }
 0x1b9   :  { %292 = vmax.xlane.f32.xlu0 %v287_v36 }
 0x23e   :  { %v291_v39 = vpop.xlane.xlu0 %290 }
 0x23f   :  { %v294_v40 = vmax.f32 %v288_v38, %v291_v39 }
 0x241   :  { %315 = vst.msk [vmem:[%s626_s8] sm:$0xff] %vm139_vm4, %v294_v40  ;;  %v319_v42 = vsub.f32 %v288_v38, %v294_v40  ;;  %335 = vst.msk [vmem:[#allocation3] sm:$0xff] %vm139_vm4, %v294_v40  ;;  %298 = vperm.xlu1 %442, %v294_v40  }
 0x242   :  { %v293_v43 = vpop.xlane.xlu0 %292 }
 0x243   :  { %v295_v44 = vmax.f32 %v289_v41, %v293_v43 }
 0x245   :  { %316 = vst.msk [vmem:[%s626_s8 + $0x8] sm:$0xff] %vm139_vm4, %v295_v44  ;;  %v320_v45 = vsub.f32 %v289_v41, %v295_v44  ;;  %336 = vst.msk [vmem:[#allocation3 + $0x8] sm:$0xff] %vm139_vm4, %v295_v44  ;;  %303 = vperm.xlu1 %442, %v295_v44   ;;  %s357_s8 = sshll.u32 %s497_s30, 4  ;;  %s358_s8 = int_to_ptr.vmem [resolvable:$true] %s357_s8 }
 0x246   :  { %s471_s10 = scalar_lea.vmem %s358_s8, 256  ;;  %p476_p1 = scmp.lt.s32.totalorder %s358_s8, %s358_s8 }
 0x247   :  { %p472_p0 = scmp.ne.s32.totalorder %s358_s8, %s471_s10  ;;  %p477_p2 = scmp.lt.s32.totalorder %s471_s10, %s471_s10 }
 0x249   :  { %p478_p3 = por %p477_p2, %p476_p1 }
 0x24b   :  { %p479_p4 = pnand %p478_p3, %p472_p0 }
 0x2bc   :  { %v299_v46 = vpop.permute.xlu1 %298 }
 0x2bd   :  { %v306_v47 = vsub.f32 %v286_v32, %v299_v46 }
 0x2bf   :  { %v308_v48 = vmul.f32 1.442695, %v306_v47 }
 0x2c0   :  { %v304_v49 = vpop.permute.xlu1 %303 }
 0x2c1   :  { %459 = vpow2.f32 %v308_v48  ;;  %v307_v50 = vsub.f32 %v287_v36, %v304_v49 }
 0x2c3   :  { %v310_v51 = vmul.f32 1.442695, %v307_v50 }
 0x2c5   :  { %461 = vpow2.f32 %v310_v51 }
 0x2ce   :  { %v460_v52 = vpop.eup %459 }
 0x2cf   :  { %312 = vst [vmem:[#allocation5] sm:$0xff] %v460_v52  ;;  %327 = vadd.xlane.f32.xlu0 %v460_v52 }
 0x2d2   :  { %v462_v53 = vpop.eup %461 }
 0x2d3   :  { %313 = vst [vmem:[#allocation5 + $0x8] sm:$0xff] %v462_v53  ;;  %329 = vadd.xlane.f32.xlu1 %v462_v53 }
 0x2d4   :  { %482 = shalt.err (!%p479_p4)
}
 0x2d5   :  { %s498_s11 = smov 128   ;;  %s499_s12 = smov 8   ;;  %v321_v54 = vmul.f32 1.442695, %v319_v42  ;;  %v323_v55 = vmul.f32 1.442695, %v320_v45 }
 0x2d6   :  { %363 = dma.vmem_to_hbm [thread:$0]  %s358_s8, 256, %s625_s7, [#allocation6], %s498_s11, %s498_s11, %s499_s12   ;;  %v317_v57 = vld [vmem:[#allocation4] sm:$0xff]  ;;  %v318_v61 = vld [vmem:[#allocation4 + $0x8] sm:$0xff]  ;;  %v340_v6 = vld [vmem:[#allocation3] sm:$0xff] }
 0x2d7   :  { %463 = vpow2.f32 %v321_v54  ;;  %v341_v10 = vld [vmem:[#allocation3 + $0x8] sm:$0xff] }
 0x2d8   :  { %465 = vpow2.f32 %v323_v55 }
 0x2e4   :  { %v464_v56 = vpop.eup %463 }
 0x2e5   :  { %v325_v58 = vmul.f32 %v464_v56, %v317_v57  ;;  %v466_v59 = vpop.eup %465 }
 0x2e6   :  { %v326_v63 = vmul.f32 %v466_v59, %v318_v61 }
 0x358   :  { %v328_v60 = vpop.xlane.xlu0 %327 }
 0x359   :  { %v331_v62 = vadd.f32 %v328_v60, %v325_v58 }
 0x35b   :  { %333 = vst.msk [vmem:[#allocation4] sm:$0xff] %vm139_vm4, %v331_v62 }
 0x35c   :  { %v330_v0 = vpop.xlane.xlu1 %329 }
 0x35d   :  { %v332_v1 = vadd.f32 %v330_v0, %v326_v63 }
 0x35f   :  { %334 = vst.msk [vmem:[#allocation4 + $0x8] sm:$0xff] %vm139_vm4, %v332_v1 }
 0x362   :  { %v342_v2 = vld [vmem:[#allocation4] sm:$0xff] }
 0x363   :  { %467 = vlog2.f32 %v342_v2 }
 0x366   :  { %v343_v3 = vld [vmem:[#allocation4 + $0x8] sm:$0xff] }
 0x367   :  { %469 = vlog2.f32 %v343_v3 }
 0x370   :  { %v468_v4 = vpop.eup %467 }
 0x371   :  { %v345_v5 = vmul.f32 0.6931472, %v468_v4 }
 0x373   :  { %v348_v7 = vadd.f32 %v345_v5, %v340_v6 }
 0x374   :  { %v470_v8 = vpop.eup %469 }
 0x375   :  { %350 = vst.msk [vmem:[%s627_s9] sm:$0xff] %vm139_vm4, %v348_v7  ;;  %v347_v9 = vmul.f32 0.6931472, %v470_v8 }
 0x377   :  { %v349_v11 = vadd.f32 %v347_v9, %v341_v10 }
 0x379   :  { %351 = vst.msk [vmem:[%s627_s9 + $0x8] sm:$0xff] %vm139_vm4, %v349_v11 }
 0x37a   :  { %491 = dma.done.wait [#allocation6], 256  }
 0x37b   :  { %492 = vsyncadd [#allocation6], 4294967040 }
 0x37c   :  { %375 = vsyncpa [#allocation6], 1 }

</bundles_post_ra>
